<compile_context>
chip_gen: v7x
topology: tpu7x:2x2x1
jax: 0.10.0
libtpu: 0.0.40
codegen_flags: <defaults>
</compile_context>

<pallas_src>
import functools

import jax
import jax.numpy as jnp
from jax.experimental import pallas as pl
from jax.experimental.pallas import tpu as pltpu


def _cdiv(a, b):
    return (a + b - 1) // b


def _round_up(a, b):
    return _cdiv(a, b) * b


def _focal_loss_kernel(logits_ref, target_ref, wt_ref, out_ref, *,
                       gamma, n_valid, tile_n):
    # Stream in native dtype, upcast in VMEM.
    x = logits_ref[...].astype(jnp.float32)               # (tile_n, C)
    t = target_ref[...]                                    # (tile_n, 1) i32
    wt = wt_ref[...]                                       # (tile_n, 1) f32 = weight[target]
    tn, c = x.shape

    # Numerically stable log-sum-exp across classes (lanes).
    m = jnp.max(x, axis=-1, keepdims=True)                                # (tn, 1)
    lse = m + jnp.log(jnp.sum(jnp.exp(x - m), axis=-1, keepdims=True))    # (tn, 1)

    # Target-logit gather as a single fused masked lane reduction.
    classes = jax.lax.broadcasted_iota(jnp.int32, (tn, c), 1)             # (tn, C)
    picked = jnp.sum(jnp.where(classes == t, x, 0.0), axis=-1, keepdims=True)

    ce = (lse - picked) * wt                                              # weighted per-sample CE

    # Focal modulation; integer gamma specialised to multiplies (no EUP pow).
    p = jnp.exp(-ce)
    one_minus_p = jnp.maximum(1.0 - p, 0.0)   # fp-round-off guard; exact match for ce >= 0
    g = float(gamma)
    if g == 0.0:
        mod = None
    elif g.is_integer() and 1 <= int(g) <= 4:
        mod = one_minus_p
        for _ in range(int(g) - 1):
            mod = mod * one_minus_p
    else:
        mod = one_minus_p ** jnp.float32(g)
    focal = ce if mod is None else mod * ce

    # Mask rows past N (the ragged last row tile reads unspecified VMEM contents).
    row = pl.program_id(0) * tile_n + jax.lax.broadcasted_iota(jnp.int32, (tn, 1), 0)
    focal = jnp.where(row < n_valid, focal, 0.0)

    # One partial sum per grid tile, written lane-dense; wrapper reads [:, 0, 0].
    out_ref[...] = jnp.broadcast_to(jnp.sum(focal), out_ref.shape)


def focal_loss(logits, target, weight=None, gamma=0.0, *, tile_rows=None):
    """Pallas TPU implementation of FocalLoss.forward.

    logits: (N, C) float32 or bfloat16
    target: (N,)   integer class indices
    weight: (C,)   per-class weight (or None)
    gamma:  float >= 0
    """
    assert gamma >= 0
    n, c = logits.shape
    itemsize = jnp.dtype(logits.dtype).itemsize
    sub = max(8, 32 // itemsize)                 # sublane alignment: 8 (f32) / 16 (bf16)
    cp_lanes = _round_up(c, 128)                 # lane-padded row width inside VMEM

    # Per-generation VMEM budget (v5e/v6e: 128 MiB physical; v7x: 64 MiB).
    try:
        phys_vmem = pltpu.get_tpu_info().vmem_capacity_bytes
    except Exception:
        phys_vmem = 64 * 1024 * 1024
    if phys_vmem >= 96 * 1024 * 1024:            # v5e / v6e
        vmem_limit, tile_budget = 64 * 1024 * 1024, 48 * 1024 * 1024
    else:                                        # v7x
        vmem_limit, tile_budget = 48 * 1024 * 1024, 32 * 1024 * 1024

    row_bytes = cp_lanes * itemsize
    if tile_rows is None:
        # Biggest double-buffered logits tile that fits the budget.
        tn = max(sub, (tile_budget // (2 * row_bytes)) // sub * sub)
        tn = min(tn, _round_up(n, sub))
        # Keep >= ~8 grid steps (megacore sharding + pipeline) while blocks stay >= ~2 MiB.
        tn_8_tiles = max(sub, _round_up(_cdiv(n, 8), sub))
        min_blk_rows = max(sub, ((2 * 1024 * 1024) // row_bytes) // sub * sub)
        if tn_8_tiles >= min_blk_rows:
            tn = min(tn, tn_8_tiles)
    else:
        tn = max(sub, _round_up(int(tile_rows), sub))
        tn = min(tn, _round_up(n, sub))
    num_tiles = _cdiv(n, tn)

    t = target.astype(jnp.int32).reshape(n, 1)
    # Per-sample class weight gathered once in the wrapper (tiny (N,) gather); the
    # kernel never touches the (C,) weight table.
    if weight is None:
        wt = jnp.ones((n, 1), dtype=jnp.float32)
    else:
        wt = jnp.take(weight.astype(jnp.float32), target.astype(jnp.int32),
                      axis=0).reshape(n, 1)

    kernel = functools.partial(_focal_loss_kernel,
                               gamma=float(gamma), n_valid=n, tile_n=tn)

    partials = pl.pallas_call(
        kernel,
        out_shape=jax.ShapeDtypeStruct((num_tiles, 8, 128), jnp.float32),
        grid=(num_tiles,),
        in_specs=[
            pl.BlockSpec((tn, c), lambda i: (i, 0)),   # logits row tile, native dtype, full C
            pl.BlockSpec((tn, 1), lambda i: (i, 0)),   # target indices
            pl.BlockSpec((tn, 1), lambda i: (i, 0)),   # gathered per-sample weight
        ],
        out_specs=pl.BlockSpec((1, 8, 128), lambda i: (i, 0, 0)),
        compiler_params=pltpu.CompilerParams(
            dimension_semantics=("parallel",),          # shard row tiles across TCs (v7x)
            vmem_limit_bytes=vmem_limit,
        ),
        cost_estimate=pl.CostEstimate(
            flops=7 * n * cp_lanes,
            transcendentals=n * cp_lanes + 3 * n,
            bytes_accessed=n * c * itemsize + 8 * n + num_tiles * 8 * 128 * 4,
        ),
    )(logits, t, wt)

    return jnp.sum(partials[:, 0, 0]) / jnp.float32(n)


def _focal_loss_ref(logits, target, weight, gamma):
    # Pure-JAX reference matching the torch module's semantics.
    logp = jax.nn.log_softmax(logits.astype(jnp.float32), axis=-1)
    ce = -jnp.take_along_axis(logp, target[:, None].astype(jnp.int32), axis=-1)[:, 0]
    if weight is not None:
        ce = ce * weight.astype(jnp.float32)[target]
    p = jnp.exp(-ce)
    return jnp.mean(((1.0 - p) ** gamma) * ce)


if __name__ == "__main__":
    key = jax.random.PRNGKey(0)
    k1, k2, k3, k4, k5, k6 = jax.random.split(key, 6)

    # Case 1: single tile, integer gamma (multiply path), class weights, f32 logits.
    N1, C1, g1 = 8, 32, 2.0
    logits1 = jax.random.normal(k1, (N1, C1), dtype=jnp.float32)
    target1 = jax.random.randint(k2, (N1,), 0, C1, dtype=jnp.int32)
    weight1 = jnp.linspace(0.5, 1.5, C1, dtype=jnp.float32)
    out1 = jax.block_until_ready(focal_loss(logits1, target1, weight1, gamma=g1))
    ref1 = _focal_loss_ref(logits1, target1, weight1, g1)
    assert jnp.allclose(out1, ref1, rtol=1e-4, atol=1e-5), (out1, ref1)

    # Case 2: multi-tile grid, C not a multiple of 128, non-integer gamma (pow path).
    N2, C2, g2 = 48, 10, 1.5
    logits2 = jax.random.normal(k3, (N2, C2), dtype=jnp.float32)
    target2 = jax.random.randint(k4, (N2,), 0, C2, dtype=jnp.int32)
    weight2 = jnp.linspace(0.25, 2.0, C2, dtype=jnp.float32)
    out2 = jax.block_until_ready(
        focal_loss(logits2, target2, weight2, gamma=g2, tile_rows=16))
    ref2 = _focal_loss_ref(logits2, target2, weight2, g2)
    assert jnp.allclose(out2, ref2, rtol=1e-4, atol=1e-5), (out2, ref2)

    # Case 3: ragged N (not a multiple of the row tile), bf16 logits streamed natively,
    # no class weights, gamma=0 (pure weighted-mean CE path).
    N3, C3, g3 = 20, 7, 0.0
    logits3 = jax.random.normal(k5, (N3, C3), dtype=jnp.float32).astype(jnp.bfloat16)
    target3 = jax.random.randint(k6, (N3,), 0, C3, dtype=jnp.int32)
    out3 = jax.block_until_ready(focal_loss(logits3, target3, None, gamma=g3, tile_rows=16))
    ref3 = _focal_loss_ref(logits3.astype(jnp.float32), target3, None, g3)
    assert jnp.allclose(out3, ref3, rtol=1e-4, atol=1e-5), (out3, ref3)

    print("KERNEL_OK")
</pallas_src>

<mosaic_0001>
module attributes {stable_mosaic.version = 11 : i64} {
  func.func @_focal_loss_kernel(%arg0: i32, %arg1: memref<8x32xf32, #tpu.memory_space<vmem>>, %arg2: memref<8x1xi32, #tpu.memory_space<vmem>>, %arg3: memref<8x1xf32, #tpu.memory_space<vmem>>, %arg4: memref<1x8x128xf32, #tpu.memory_space<vmem>>) attributes {dimension_semantics = [#tpu.dimension_semantics<parallel>], iteration_bounds = array<i64: 1>, scalar_prefetch = 0 : i64, scratch_operands = 0 : i64, tpu.core_type = #tpu.core_type<tc>, window_params = [{transform_indices = @transform_0, window_bounds = array<i64: 8, 32>}, {transform_indices = @transform_1, window_bounds = array<i64: 8, 1>}, {transform_indices = @transform_2, window_bounds = array<i64: 8, 1>}, {transform_indices = @transform_3, window_bounds = array<i64: 1, 8, 128>}]} {
    %c0 = arith.constant 0 : index
    %c0_0 = arith.constant 0 : index
    %0 = vector.load %arg1[%c0, %c0_0] : memref<8x32xf32, #tpu.memory_space<vmem>>, vector<8x32xf32>
    %c0_1 = arith.constant 0 : index
    %c0_2 = arith.constant 0 : index
    %1 = vector.load %arg2[%c0_1, %c0_2] : memref<8x1xi32, #tpu.memory_space<vmem>>, vector<8x1xi32>
    %c0_3 = arith.constant 0 : index
    %c0_4 = arith.constant 0 : index
    %2 = vector.load %arg3[%c0_3, %c0_4] : memref<8x1xf32, #tpu.memory_space<vmem>>, vector<8x1xf32>
    %cst = arith.constant dense<0xFF800000> : vector<8xf32>
    %3 = vector.multi_reduction <maximumf>, %0, %cst [1] : vector<8x32xf32> to vector<8xf32>
    %4 = vector.shape_cast %3 : vector<8xf32> to vector<8x1xf32>
    %5 = vector.broadcast %4 : vector<8x1xf32> to vector<8x32xf32>
    %6 = arith.subf %0, %5 : vector<8x32xf32>
    %7 = math.exp %6 : vector<8x32xf32>
    %cst_5 = arith.constant dense<0.000000e+00> : vector<8xf32>
    %8 = vector.multi_reduction <add>, %7, %cst_5 [1] : vector<8x32xf32> to vector<8xf32>
    %9 = vector.shape_cast %8 : vector<8xf32> to vector<8x1xf32>
    %10 = math.log %9 : vector<8x1xf32>
    %11 = arith.addf %4, %10 : vector<8x1xf32>
    %12 = tpu.iota {dimensions = array<i32: 1>} : vector<8x32xi32>
    %13 = vector.broadcast %1 : vector<8x1xi32> to vector<8x32xi32>
    %14 = arith.cmpi eq, %12, %13 : vector<8x32xi32>
    %cst_6 = arith.constant 0.000000e+00 : f32
    %15 = vector.broadcast %cst_6 : f32 to vector<8x32xf32>
    %16 = arith.select %14, %0, %15 : vector<8x32xi1>, vector<8x32xf32>
    %cst_7 = arith.constant dense<0.000000e+00> : vector<8xf32>
    %17 = vector.multi_reduction <add>, %16, %cst_7 [1] : vector<8x32xf32> to vector<8xf32>
    %18 = vector.shape_cast %17 : vector<8xf32> to vector<8x1xf32>
    %19 = arith.subf %11, %18 : vector<8x1xf32>
    %20 = arith.mulf %19, %2 : vector<8x1xf32>
    %cst_8 = arith.constant 0.000000e+00 : f32
    %21 = vector.broadcast %cst_8 : f32 to vector<8x1xf32>
    %22 = arith.subf %21, %20 : vector<8x1xf32>
    %23 = math.exp %22 : vector<8x1xf32>
    %cst_9 = arith.constant 1.000000e+00 : f32
    %24 = vector.broadcast %cst_9 : f32 to vector<8x1xf32>
    %25 = arith.subf %24, %23 : vector<8x1xf32>
    %cst_10 = arith.constant 0.000000e+00 : f32
    %26 = vector.broadcast %cst_10 : f32 to vector<8x1xf32>
    %27 = arith.maximumf %25, %26 : vector<8x1xf32>
    %28 = arith.mulf %27, %27 : vector<8x1xf32>
    %29 = arith.mulf %28, %20 : vector<8x1xf32>
    %c8_i32 = arith.constant 8 : i32
    %30 = arith.muli %arg0, %c8_i32 : i32
    %31 = tpu.iota {dimensions = array<i32: 0>} : vector<8x1xi32>
    %32 = vector.broadcast %30 : i32 to vector<8x1xi32>
    %33 = arith.addi %32, %31 : vector<8x1xi32>
    %c8_i32_11 = arith.constant 8 : i32
    %34 = vector.broadcast %c8_i32_11 : i32 to vector<8x1xi32>
    %35 = arith.cmpi slt, %33, %34 : vector<8x1xi32>
    %cst_12 = arith.constant 0.000000e+00 : f32
    %36 = vector.broadcast %cst_12 : f32 to vector<8x1xf32>
    %37 = arith.select %35, %29, %36 : vector<8x1xi1>, vector<8x1xf32>
    %38 = vector.shape_cast %37 : vector<8x1xf32> to vector<1x8x1xf32>
    %cst_13 = arith.constant dense<0.000000e+00> : vector<1xf32>
    %39 = vector.multi_reduction <add>, %38, %cst_13 [1, 2] : vector<1x8x1xf32> to vector<1xf32>
    %40 = vector.shape_cast %39 : vector<1xf32> to vector<1x1x1xf32>
    %41 = vector.extract %40[0, 0, 0] : f32 from vector<1x1x1xf32>
    %42 = vector.broadcast %41 : f32 to vector<1x8x128xf32>
    %c0_14 = arith.constant 0 : index
    %c0_15 = arith.constant 0 : index
    %c0_16 = arith.constant 0 : index
    %43 = vector.load %arg4[%c0_14, %c0_15, %c0_16] : memref<1x8x128xf32, #tpu.memory_space<vmem>>, vector<1x8x128xf32>
    tpu.vector_store %arg4[%c0_14, %c0_15, %c0_16], %42 {strides = array<i32>} : memref<1x8x128xf32, #tpu.memory_space<vmem>>, vector<1x8x128xf32>,
    return
  }
  func.func @transform_0(%arg0: i32) -> (i32, i32) {
    %c0_i32 = arith.constant 0 : i32
    %c0_i32_0 = arith.constant 0 : i32
    return %arg0, %c0_i32 : i32, i32
  }
  func.func @transform_1(%arg0: i32) -> (i32, i32) {
    %c0_i32 = arith.constant 0 : i32
    %c0_i32_0 = arith.constant 0 : i32
    return %arg0, %c0_i32 : i32, i32
  }
  func.func @transform_2(%arg0: i32) -> (i32, i32) {
    %c0_i32 = arith.constant 0 : i32
    %c0_i32_0 = arith.constant 0 : i32
    return %arg0, %c0_i32 : i32, i32
  }
  func.func @transform_3(%arg0: i32) -> (i32, i32, i32) {
    %c0_i32 = arith.constant 0 : i32
    %c0_i32_0 = arith.constant 0 : i32
    %c0_i32_1 = arith.constant 0 : i32
    return %arg0, %c0_i32, %c0_i32_0 : i32, i32, i32
  }
}

</mosaic_0001>

<bundles_post_ra>
// kernel: tpu_custom_call.1
= control target key start
LH: loop header
LB: loop body
LE: loop exit
PB: predicated region body
PF: predicated region fallthrough
CT: control target
= control target key end

     0   :  { %vm18_vm0 = vcmask 261120   ;;  %s165_s0 = inlined_call_operand.vmem [shape: f32[8,32], index: 0, kind: input, shape index: {}]   ;;  %s166_s1 = inlined_call_operand.vmem [shape: s32[8,1], index: 1, kind: input, shape index: {}]   ;;  %s167_s2 = inlined_call_operand.vmem [shape: f32[8,1], index: 2, kind: input, shape index: {}]   ;;  %s168_s3 = inlined_call_operand.hbm [shape: f32[1,8,128], index: 3, kind: output, shape index: {}]  }
   0x1   :  { %v15_v0 = vld [vmem:[%s165_s0] sm:$0xff] }
   0x2   :  { %8 = vsyncpa [#allocation3], 0  ;;  %v19_v1 = vsel %vm18_vm0, %v15_v0, -inf  ;;  %v119_v2 = vmov 0   ;;  %v16_v3 = vld [vmem:[%s166_s1] sm:$0xff]  ;;  %v31_v7 = vlaneseq  ;;  %vm57_vm2 = vcmask 7168  }
   0x3   :  { %88 = vset.pattern.permute.xlu0 %v119_v2  ;;  %v17_v19 = vld [vmem:[%s167_s2] sm:$0xff]  ;;  %s120_s2 = smov [#allocation2]  }
   0x4   :  { %20 = vmax.xlane.f32.xlu0 %v19_v1  ;;  %v32_v8 = vand.u32 127, %v31_v7  ;;  %s76_s16 = sshll.u32 %s120_s2, 4  ;;  %s77_s16 = int_to_ptr.vmem [resolvable:$true] %s76_s16 }
   0x5   :  { %s95_s18 = scalar_lea.vmem %s77_s16, 128  ;;  %p100_p1 = scmp.lt.s32.totalorder %s77_s16, %s77_s16 }
   0x6   :  { %p96_p0 = scmp.ne.s32.totalorder %s77_s16, %s95_s18  ;;  %p101_p2 = scmp.lt.s32.totalorder %s95_s18, %s95_s18 }
   0x8   :  { %p102_p3 = por %p101_p2, %p100_p1 }
   0xa   :  { %p103_p4 = pnand %p102_p3, %p96_p0 }
  0x1a   :  { %34 = vperm.xlu0 %88, %v16_v3  }
  0x91   :  { %v21_v4 = vpop.xlane.xlu0 %20 }
  0x92   :  { %v22_v5 = vsub.f32 %v15_v0, %v21_v4 }
  0x94   :  { %v23_v6 = vmul.f32 1.442695, %v22_v5 }
  0x96   :  { %89 = vpow2.f32 %v23_v6 }
  0x99   :  { %v35_v9 = vpop.permute.xlu0 %34 }
  0x9a   :  { %vm36_vm1 = vcmp.eq.s32.totalorder %v32_v8, %v35_v9 }
  0x9b   :  { %v37_v11 = vsel %vm36_vm1, %v15_v0, 0.0 }
  0x9c   :  { %v38_v13 = vsel %vm18_vm0, %v37_v11, 0.0 }
  0xa0   :  { %v90_v10 = vpop.eup %89 }
  0xa1   :  { %v25_v12 = vsel %vm18_vm0, %v90_v10, 0.0 }
  0xa2   :  { %26 = vadd.xlane.f32.xlu1 %v25_v12 }
  0xa6   :  { %39 = vadd.xlane.f32.xlu1 %v38_v13 }
 0x12f   :  { %v27_v14 = vpop.xlane.xlu1 %26 }
 0x130   :  { %91 = vlog2.f32 %v27_v14 }
 0x133   :  { %v40_v17 = vpop.xlane.xlu1 %39 }
 0x13a   :  { %v92_v15 = vpop.eup %91 }
 0x13b   :  { %v29_v16 = vmul.f32 0.6931472, %v92_v15 }
 0x13d   :  { %v30_v18 = vadd.f32 %v29_v16, %v21_v4 }
 0x13f   :  { %v41_v20 = vsub.f32 %v30_v18, %v40_v17 }
 0x141   :  { %v42_v21 = vmul.f32 %v41_v20, %v17_v19 }
 0x143   :  { %v43_v22 = vsub.f32 0.0, %v42_v21 }
 0x145   :  { %v44_v23 = vmul.f32 1.442695, %v43_v22 }
 0x147   :  { %93 = vpow2.f32 %v44_v23 }
 0x151   :  { %v94_v24 = vpop.eup %93 }
 0x152   :  { %v46_v25 = vsub.f32 1.0, %v94_v24 }
 0x154   :  { %v47_v26 = vmax.f32 %v46_v25, 0.0 }
 0x156   :  { %v48_v27 = vmul.f32 %v47_v26, %v47_v26 }
 0x158   :  { %v49_v28 = vmul.f32 %v48_v27, %v42_v21 }
 0x15a   :  { %v58_v29 = vsel %vm57_vm2, %v49_v28, 0.0 }
 0x15b   :  { %59 = vadd.xlane.f32.xlu1 %v58_v29 }
 0x1e8   :  { %v60_v30 = vpop.xlane.xlu1 %59 }
 0x1e9   :  { %v61_v31 = vrot.slane %v60_v30, 4 }
 0x1eb   :  { %v62_v32 = vadd.f32 %v61_v31, %v60_v30 }
 0x1ed   :  { %v63_v33 = vrot.slane %v62_v32, 2 }
 0x1ef   :  { %v64_v34 = vadd.f32 %v63_v33, %v62_v32 }
 0x1f1   :  { %v65_v35 = vrot.slane %v64_v34, 1 }
 0x1f3   :  { %v66_v36 = vadd.f32 %v65_v35, %v64_v34 }
 0x1f5   :  { %84 = vpush %v66_v36 }
 0x226   :  { %s85_s17 = spop %84 }
 0x227   :  { %v68_v37 = vstv %s85_s17 }
 0x228   :  { %69 = vst [vmem:[#allocation2] sm:$0xff] %v68_v37 }
 0x229   :  { %106 = shalt.err (!%p103_p4)
}
 0x22a   :  { %s107_s21 = scalar_lea.hbm %s168_s3, 128 }
 0x22b   :  { %p108_p5 = scmp.ne.s32.totalorder %s168_s3, %s107_s21  ;;  %p111_p6 = scmp.lt.u32.totalorder %s107_s21, %s168_s3 }
 0x22d   :  { %p113_p7 = pnand %p111_p6, %p108_p5 }
 0x22f   :  { %116 = shalt.err (!%p113_p7)
}
 0x230   :  { %79 = dma.vmem_to_hbm [thread:$0]  %s77_s16, 128, %s168_s3, [#allocation3]  }
 0x231   :  { %117 = dma.done.wait [#allocation3], 128  }
 0x232   :  { %118 = vsyncadd [#allocation3], 4294967168 }
 0x233   :  { %83 = vsyncpa [#allocation3], 1 }

</bundles_post_ra>
